<compile_context>
chip_gen: v7x
topology: tpu7x:2x2x1
jax: 0.10.0
libtpu: 0.0.40
codegen_flags: <defaults>
</compile_context>

<pallas_src>
import jax
import jax.numpy as jnp
from jax import lax
from jax.experimental import pallas as pl
from jax.experimental.pallas import tpu as pltpu

SLICES = 15  # fixed by the module (self.slices = 15)


# ---------------------------------------------------------------------------
# Fused kernel
#   grid = (B, K // tk)    -- ("parallel", "arbitrary")
#   inputs : feats [S, tk] (f32/bf16, cast in-kernel), conv_w [N, tk] bf16,
#            conv_b [N, S] f32 (pre-broadcast), selT [S, Dp] bf16,
#            mask [N, Dp] bf16, attn_wT [Dp, Dp] f32, attn_b [1, Dp] f32
#   output : out [1, N] f32 (one row per volume)
#   scratch: acc [N, S] f32  (resident across the K axis, re-init per volume)
# ---------------------------------------------------------------------------
def _fused_head_kernel(f_ref, w_ref, b_ref, selT_ref, mask_ref, awt_ref,
                       ab_ref, o_ref, acc_ref):
    k = pl.program_id(1)

    @pl.when(k == 0)
    def _():
        # Bias-initialized accumulator (removes the epilogue "+ bias").
        acc_ref[...] = b_ref[...]

    # conv_collapse partial sum: [N, tk] x [S, tk] -> [N, S] (contract K).
    # NT form contracting the lane dim of both operands -- same pattern as the
    # flash-attention Q @ K^T matmul, no materialized operand transpose.
    # feats are cast to bf16 here (no wrapper-side HBM round trip); the MXU
    # products are bf16-exact with f32 accumulation.
    acc_ref[...] += lax.dot_general(
        w_ref[...], f_ref[...].astype(jnp.bfloat16),
        dimension_numbers=(((1,), (1,)), ((), ())),
        preferred_element_type=jnp.float32)

    @pl.when(k == pl.num_programs(1) - 1)
    def _():
        S = acc_ref.shape[1]
        xs = acc_ref[...]                                        # [N, S] f32
        selT = selT_ref[...].astype(jnp.float32)                 # [S, Dp] 0/1
        msk = mask_ref[...].astype(jnp.float32)                  # [N, Dp] 0/1

        # Flatten xs -> x_flat[0, o*S + s] = xs[o, s] (torch flatten order)
        # without in-kernel reshape (sublane<->lane reshapes do not lower):
        #   selT[s, m] = 1 iff (m % S) == s   ->  (xs @ selT)[o, m] = xs[o, m % S]
        #   msk [o, m] = 1 iff (m // S) == o  (0 on the padded lanes m >= D)
        x_lanes = jnp.dot(xs, selT, preferred_element_type=jnp.float32)   # [N, Dp]
        x_flat = jnp.sum(x_lanes * msk, axis=0, keepdims=True)            # [1, Dp]

        # Attention FC (torch layout, zero-padded to Dp lanes) + sigmoid.
        logits = jnp.dot(x_flat, awt_ref[...],
                         preferred_element_type=jnp.float32) + ab_ref[...]
        attn = jax.nn.sigmoid(logits)                                      # [1, Dp]

        # Attention-weighted slice average:
        #   out[0, o] = (1/S) * sum_s xs[o, s] * attn[0, o*S + s]
        out = lax.dot_general(
            x_flat * attn, msk,
            dimension_numbers=(((1,), (1,)), ((), ())),
            preferred_element_type=jnp.float32)                            # [1, N]
        o_ref[...] = (out * (1.0 / S)).astype(o_ref.dtype)


def _pick_tk(K, cap=50176):
    """Largest divisor of K that is a multiple of 128 and <= cap, else K.

    cap=50176 -> 2 grid steps for ResNet18's K = 512*14*14 = 100352 while the
    double-buffered f32 feats tile stays ~6 MiB (well under the 32 MiB scoped
    VMEM limit); fewer, larger steps amortize the ~0.35 us per-step overhead
    against v7x's 3.2 TB/s HBM.
    """
    best = None
    for tk in range(128, min(K, cap) + 1, 128):
        if K % tk == 0:
            best = tk
    if best is None:
        # No multiple-of-128 divisor <= cap: fall back to a single full-K block
        # (legal: block == full dim) -> 1-step K grid, no K pipelining.
        return K
    return best


# ---------------------------------------------------------------------------
# Parameter init (deterministic, PyTorch-default-style uniform bounds)
# ---------------------------------------------------------------------------
def init_params(key, n_outputs, c_feat, hf, wf):
    k1, k2, k3, k4 = jax.random.split(key, 4)
    fan_in_conv = c_feat * hf * wf
    bc = 1.0 / (fan_in_conv ** 0.5)
    conv_w = jax.random.uniform(k1, (n_outputs, c_feat, hf, wf),
                                jnp.float32, -bc, bc)
    conv_b = jax.random.uniform(k2, (n_outputs,), jnp.float32, -bc, bc)
    d = n_outputs * SLICES
    bl = 1.0 / (d ** 0.5)
    attn_w = jax.random.uniform(k3, (d, d), jnp.float32, -bl, bl)
    attn_b = jax.random.uniform(k4, (d,), jnp.float32, -bl, bl)
    return dict(conv_w=conv_w, conv_b=conv_b, attn_w=attn_w, attn_b=attn_b)


def prepare_params(params, n_outputs):
    """One-time offline weight relayout for the fused kernel.

    - conv weight: lane-dense [N, K], bf16.
    - conv bias: pre-broadcast to the [N, S] accumulator shape.
    - attention FC: attn_w.T / attn_b zero-padded from D = 15*N to the next
      multiple of 128 lanes (torch flatten order is already the natural
      row-major order of the [N, S] accumulator -> no permutation needed).
    - selection constants (exact 0/1, bf16) built once here, not per forward.
    """
    N = n_outputs
    S = SLICES
    D = N * S
    Dp = pl.cdiv(D, 128) * 128
    conv_w = params["conv_w"]
    K = conv_w.shape[1] * conv_w.shape[2] * conv_w.shape[3]

    conv_w_nk = conv_w.reshape(N, K).astype(jnp.bfloat16)                 # [N, K]
    conv_b_ns = jnp.broadcast_to(
        params["conv_b"].astype(jnp.float32)[:, None], (N, S))           # [N, S]

    # Attention FC, zero-padded.  Kept f32 here (57 KB at N=8).
    # TODO(synk): for large n_outputs (Dp^2 f32 grows as (15N)^2*4B) switch this
    # to bf16 and/or give it its own K-style tiling to stay under v7x's 64 MiB.
    awt = jnp.zeros((Dp, Dp), jnp.float32).at[:D, :D].set(
        params["attn_w"].T.astype(jnp.float32))                          # [Dp, Dp]
    ab = jnp.zeros((1, Dp), jnp.float32).at[:, :D].set(
        params["attn_b"].astype(jnp.float32)[None, :])                   # [1, Dp]

    m = jnp.arange(Dp)
    valid = m < D
    selT = ((m[None, :] % S == jnp.arange(S)[:, None])
            & valid[None, :]).astype(jnp.bfloat16)                       # [S, Dp]
    mask = ((m[None, :] // S == jnp.arange(N)[:, None])
            & valid[None, :]).astype(jnp.bfloat16)                       # [N, Dp]

    return dict(conv_w=conv_w_nk, conv_b=conv_b_ns, attn_wt=awt, attn_b=ab,
                selT=selT, mask=mask)


# ---------------------------------------------------------------------------
# Forward (head of Body_Cll_Avg_HSliceAttn, post ResNet18 features)
# ---------------------------------------------------------------------------
def body_cll_avg_hslice_attn(feats, prepared, n_outputs):
    """feats: [B, SLICES, C, H, W] or [SLICES, C, H, W], f32 or bf16.

    No dtype cast in the wrapper (a separate convert op would add a full extra
    HBM pass over feats); the kernel casts to bf16 in VMEM.  Best case, the
    backbone emits bf16 and the cast is a no-op.
    """
    squeeze_batch = feats.ndim == 4
    if squeeze_batch:
        feats = feats[None]
    B, S, C, H, W = feats.shape
    assert S == SLICES
    K = C * H * W
    N = n_outputs
    Dp = prepared["selT"].shape[1]

    feats_flat = feats.reshape(B, S, K)          # reshape is free; no astype

    tk = _pick_tk(K)
    grid = (B, K // tk)

    out = pl.pallas_call(
        _fused_head_kernel,
        out_shape=jax.ShapeDtypeStruct((B, 1, N), jnp.float32),
        grid_spec=pltpu.PrefetchScalarGridSpec(
            num_scalar_prefetch=0,
            grid=grid,
            in_specs=[
                pl.BlockSpec((None, S, tk), lambda b, k: (b, 0, k)),  # feats
                pl.BlockSpec((N, tk), lambda b, k: (0, k)),           # conv w
                pl.BlockSpec((N, S), lambda b, k: (0, 0)),            # conv b
                pl.BlockSpec((S, Dp), lambda b, k: (0, 0)),           # selT
                pl.BlockSpec((N, Dp), lambda b, k: (0, 0)),           # mask
                pl.BlockSpec((Dp, Dp), lambda b, k: (0, 0)),          # attn w^T
                pl.BlockSpec((1, Dp), lambda b, k: (0, 0)),           # attn b
            ],
            out_specs=pl.BlockSpec((None, 1, N), lambda b, k: (b, 0, 0)),
            scratch_shapes=[pltpu.VMEM((N, S), jnp.float32)],
        ),
        compiler_params=pltpu.CompilerParams(
            # Batch axis "parallel" -> v7x's two TensorCores split volumes;
            # K reduction axis last and "arbitrary" (resident accumulator).
            dimension_semantics=("parallel", "arbitrary"),
            # Double-buffered tiles at tk=50176: ~6 MiB f32 feats + ~1.6 MiB
            # bf16 weight -- comfortably under 32 MiB on v5e/v6e/v7x.
            vmem_limit_bytes=32 * 1024 * 1024,
        ),
    )(feats_flat, prepared["conv_w"], prepared["conv_b"],
      prepared["selT"], prepared["mask"], prepared["attn_wt"],
      prepared["attn_b"])

    out = out.reshape(B, N)
    return out[0:1] if squeeze_batch else out


# ---------------------------------------------------------------------------
# Pure-JAX reference (mirrors bf16 conv-collapse products, f32 accumulation)
# ---------------------------------------------------------------------------
def reference(feats, params, n_outputs):
    if feats.ndim == 4:
        feats = feats[None]
    B, S = feats.shape[0], feats.shape[1]
    N = n_outputs
    f = feats.reshape(B, S, -1).astype(jnp.bfloat16)
    w = params["conv_w"].reshape(N, -1).astype(jnp.bfloat16)
    xs = jnp.einsum("bsk,nk->bsn", f, w,
                    preferred_element_type=jnp.float32) + params["conv_b"]
    x_t = jnp.swapaxes(xs, 1, 2)                       # [B, N, S]
    x_flat = x_t.reshape(B, N * S)                     # torch (o*S + s) order
    attn = jax.nn.sigmoid(
        jnp.dot(x_flat, params["attn_w"].T,
                precision=lax.Precision.HIGHEST) + params["attn_b"])
    attn_map = attn.reshape(B, N, S)
    return jnp.mean(x_t * attn_map, axis=2)            # [B, N]


if __name__ == "__main__":
    n_outputs = 8
    B = 2                          # two volumes -> exercises the parallel axis
    C_FEAT, HF, WF = 32, 14, 14    # small stand-in for ResNet18's [512, 14, 14]

    key = jax.random.PRNGKey(0)
    kf, kp = jax.random.split(key)
    feats = jax.random.normal(kf, (B, SLICES, C_FEAT, HF, WF), jnp.float32)
    params = init_params(kp, n_outputs, C_FEAT, HF, WF)
    prepared = prepare_params(params, n_outputs)

    out = body_cll_avg_hslice_attn(feats, prepared, n_outputs)
    out = jax.block_until_ready(out)

    ref = reference(feats, params, n_outputs)
    assert out.shape == (B, n_outputs), out.shape
    assert jnp.allclose(out, ref, rtol=1e-3, atol=1e-3), (out, ref)
    print("KERNEL_OK")
</pallas_src>

<mosaic_0001>
module attributes {stable_mosaic.version = 11 : i64} {
  func.func @_fused_head_kernel(%arg0: i32, %arg1: i32, %arg2: memref<1x15x6272xf32, #tpu.memory_space<vmem>>, %arg3: memref<8x6272xbf16, #tpu.memory_space<vmem>>, %arg4: memref<8x15xf32, #tpu.memory_space<vmem>>, %arg5: memref<15x128xbf16, #tpu.memory_space<vmem>>, %arg6: memref<8x128xbf16, #tpu.memory_space<vmem>>, %arg7: memref<128x128xf32, #tpu.memory_space<vmem>>, %arg8: memref<1x128xf32, #tpu.memory_space<vmem>>, %arg9: memref<1x1x8xf32, #tpu.memory_space<vmem>>, %arg10: memref<8x15xf32, #tpu.memory_space<vmem>>) attributes {dimension_semantics = [#tpu.dimension_semantics<parallel>, #tpu.dimension_semantics<arbitrary>], iteration_bounds = array<i64: 2, 1>, scalar_prefetch = 0 : i64, scratch_operands = 1 : i64, tpu.core_type = #tpu.core_type<tc>, window_params = [{transform_indices = @transform_0, window_bounds = array<i64: 1, 15, 6272>}, {transform_indices = @transform_1, window_bounds = array<i64: 8, 6272>}, {pipeline_mode = #tpu.pipeline_mode<synchronous>, transform_indices = @transform_2, window_bounds = array<i64: 8, 15>}, {pipeline_mode = #tpu.pipeline_mode<synchronous>, transform_indices = @transform_3, window_bounds = array<i64: 15, 128>}, {pipeline_mode = #tpu.pipeline_mode<synchronous>, transform_indices = @transform_4, window_bounds = array<i64: 8, 128>}, {pipeline_mode = #tpu.pipeline_mode<synchronous>, transform_indices = @transform_5, window_bounds = array<i64: 128, 128>}, {pipeline_mode = #tpu.pipeline_mode<synchronous>, transform_indices = @transform_6, window_bounds = array<i64: 1, 128>}, {transform_indices = @transform_7, window_bounds = array<i64: 1, 1, 8>}]} {
    %c0_i32 = arith.constant 0 : i32
    %0 = arith.cmpi eq, %arg1, %c0_i32 : i32
    %1 = arith.extui %0 : i1 to i32
    %c0_i32_0 = arith.constant 0 : i32
    %2 = arith.cmpi ne, %1, %c0_i32_0 : i32
    scf.if %2 {
      %c0_11 = arith.constant 0 : index
      %c0_12 = arith.constant 0 : index
      %14 = vector.load %arg4[%c0_11, %c0_12] : memref<8x15xf32, #tpu.memory_space<vmem>>, vector<8x15xf32>
      %c0_13 = arith.constant 0 : index
      %c0_14 = arith.constant 0 : index
      %15 = vector.load %arg10[%c0_13, %c0_14] : memref<8x15xf32, #tpu.memory_space<vmem>>, vector<8x15xf32>
      tpu.vector_store %arg10[%c0_13, %c0_14], %14 {strides = array<i32>} : memref<8x15xf32, #tpu.memory_space<vmem>>, vector<8x15xf32>,
    } else {
    }
    %c0 = arith.constant 0 : index
    %c0_1 = arith.constant 0 : index
    %3 = vector.load %arg10[%c0, %c0_1] : memref<8x15xf32, #tpu.memory_space<vmem>>, vector<8x15xf32>
    %c0_2 = arith.constant 0 : index
    %c0_3 = arith.constant 0 : index
    %4 = vector.load %arg3[%c0_2, %c0_3] : memref<8x6272xbf16, #tpu.memory_space<vmem>>, vector<8x6272xbf16>
    %c0_4 = arith.constant 0 : index
    %c0_5 = arith.constant 0 : index
    %c0_6 = arith.constant 0 : index
    %5 = vector.load %arg2[%c0_4, %c0_5, %c0_6] : memref<1x15x6272xf32, #tpu.memory_space<vmem>>, vector<1x15x6272xf32>
    %6 = vector.shape_cast %5 : vector<1x15x6272xf32> to vector<15x6272xf32>
    %7 = arith.truncf %6 : vector<15x6272xf32> to vector<15x6272xbf16>
    %cst = arith.constant dense<0.000000e+00> : vector<8x15xf32>
    %8 = tpu.matmul %4, %7, %cst {dimension_numbers = #tpu.dot_dimension_numbers<[1], [1], [0], [0], [0, 0, 1, 0], [], []>} : vector<8x6272xbf16>, vector<15x6272xbf16>, vector<8x15xf32> -> vector<8x15xf32>
    %9 = arith.addf %3, %8 : vector<8x15xf32>
    %c0_7 = arith.constant 0 : index
    %c0_8 = arith.constant 0 : index
    %10 = vector.load %arg10[%c0_7, %c0_8] : memref<8x15xf32, #tpu.memory_space<vmem>>, vector<8x15xf32>
    tpu.vector_store %arg10[%c0_7, %c0_8], %9 {strides = array<i32>} : memref<8x15xf32, #tpu.memory_space<vmem>>, vector<8x15xf32>,
    %c0_i32_9 = arith.constant 0 : i32
    %11 = arith.cmpi eq, %arg1, %c0_i32_9 : i32
    %12 = arith.extui %11 : i1 to i32
    %c0_i32_10 = arith.constant 0 : i32
    %13 = arith.cmpi ne, %12, %c0_i32_10 : i32
    scf.if %13 {
      %c0_11 = arith.constant 0 : index
      %c0_12 = arith.constant 0 : index
      %14 = vector.load %arg10[%c0_11, %c0_12] : memref<8x15xf32, #tpu.memory_space<vmem>>, vector<8x15xf32>
      %c0_13 = arith.constant 0 : index
      %c0_14 = arith.constant 0 : index
      %15 = vector.load %arg5[%c0_13, %c0_14] : memref<15x128xbf16, #tpu.memory_space<vmem>>, vector<15x128xbf16>
      %16 = arith.extf %15 : vector<15x128xbf16> to vector<15x128xf32>
      %c0_15 = arith.constant 0 : index
      %c0_16 = arith.constant 0 : index
      %17 = vector.load %arg6[%c0_15, %c0_16] : memref<8x128xbf16, #tpu.memory_space<vmem>>, vector<8x128xbf16>
      %18 = arith.extf %17 : vector<8x128xbf16> to vector<8x128xf32>
      %cst_17 = arith.constant dense<0.000000e+00> : vector<8x128xf32>
      %19 = tpu.matmul %14, %16, %cst_17 {dimension_numbers = #tpu.dot_dimension_numbers<[1], [0], [0], [1], [0, 0, 1, 1], [], []>} : vector<8x15xf32>, vector<15x128xf32>, vector<8x128xf32> -> vector<8x128xf32>
      %20 = arith.mulf %19, %18 : vector<8x128xf32>
      %cst_18 = arith.constant dense<0.000000e+00> : vector<128xf32>
      %21 = vector.multi_reduction <add>, %20, %cst_18 [0] : vector<8x128xf32> to vector<128xf32>
      %22 = vector.shape_cast %21 : vector<128xf32> to vector<1x128xf32>
      %c0_19 = arith.constant 0 : index
      %c0_20 = arith.constant 0 : index
      %23 = vector.load %arg7[%c0_19, %c0_20] : memref<128x128xf32, #tpu.memory_space<vmem>>, vector<128x128xf32>
      %cst_21 = arith.constant dense<0.000000e+00> : vector<1x128xf32>
      %24 = tpu.matmul %22, %23, %cst_21 {dimension_numbers = #tpu.dot_dimension_numbers<[1], [0], [0], [1], [0, 0, 1, 1], [], []>} : vector<1x128xf32>, vector<128x128xf32>, vector<1x128xf32> -> vector<1x128xf32>
      %c0_22 = arith.constant 0 : index
      %c0_23 = arith.constant 0 : index
      %25 = vector.load %arg8[%c0_22, %c0_23] : memref<1x128xf32, #tpu.memory_space<vmem>>, vector<1x128xf32>
      %26 = arith.addf %24, %25 : vector<1x128xf32>
      %27 = arith.negf %26 : vector<1x128xf32>
      %28 = math.exp %27 : vector<1x128xf32>
      %cst_24 = arith.constant 1.000000e+00 : f32
      %29 = vector.broadcast %cst_24 : f32 to vector<1x128xf32>
      %30 = arith.addf %29, %28 : vector<1x128xf32>
      %31 = arith.divf %29, %30 : vector<1x128xf32>
      %32 = arith.mulf %22, %31 : vector<1x128xf32>
      %cst_25 = arith.constant dense<0.000000e+00> : vector<1x8xf32>
      %33 = tpu.matmul %32, %18, %cst_25 {dimension_numbers = #tpu.dot_dimension_numbers<[1], [1], [0], [0], [0, 0, 1, 0], [], []>} : vector<1x128xf32>, vector<8x128xf32>, vector<1x8xf32> -> vector<1x8xf32>
      %cst_26 = arith.constant 0.0666666701 : f32
      %34 = vector.broadcast %cst_26 : f32 to vector<1x8xf32>
      %35 = arith.mulf %33, %34 : vector<1x8xf32>
      %c0_27 = arith.constant 0 : index
      %c0_28 = arith.constant 0 : index
      %c0_29 = arith.constant 0 : index
      %36 = vector.load %arg9[%c0_27, %c0_28, %c0_29] : memref<1x1x8xf32, #tpu.memory_space<vmem>>, vector<1x1x8xf32>
      %37 = vector.shape_cast %36 : vector<1x1x8xf32> to vector<1x8xf32>
      %38 = vector.shape_cast %35 : vector<1x8xf32> to vector<1x1x8xf32>
      tpu.vector_store %arg9[%c0_27, %c0_28, %c0_29], %38 {strides = array<i32>} : memref<1x1x8xf32, #tpu.memory_space<vmem>>, vector<1x1x8xf32>,
    } else {
    }
    return
  }
  func.func @transform_0(%arg0: i32, %arg1: i32) -> (i32, i32, i32) {
    %c0_i32 = arith.constant 0 : i32
    %c0_i32_0 = arith.constant 0 : i32
    return %arg0, %c0_i32, %arg1 : i32, i32, i32
  }
  func.func @transform_1(%arg0: i32, %arg1: i32) -> (i32, i32) {
    %c0_i32 = arith.constant 0 : i32
    %c0_i32_0 = arith.constant 0 : i32
    return %c0_i32, %arg1 : i32, i32
  }
  func.func @transform_2(%arg0: i32, %arg1: i32) -> (i32, i32) {
    %c0_i32 = arith.constant 0 : i32
    %c0_i32_0 = arith.constant 0 : i32
    %c0_i32_1 = arith.constant 0 : i32
    return %c0_i32, %c0_i32_0 : i32, i32
  }
  func.func @transform_3(%arg0: i32, %arg1: i32) -> (i32, i32) {
    %c0_i32 = arith.constant 0 : i32
    %c0_i32_0 = arith.constant 0 : i32
    %c0_i32_1 = arith.constant 0 : i32
    return %c0_i32, %c0_i32_0 : i32, i32
  }
  func.func @transform_4(%arg0: i32, %arg1: i32) -> (i32, i32) {
    %c0_i32 = arith.constant 0 : i32
    %c0_i32_0 = arith.constant 0 : i32
    %c0_i32_1 = arith.constant 0 : i32
    return %c0_i32, %c0_i32_0 : i32, i32
  }
  func.func @transform_5(%arg0: i32, %arg1: i32) -> (i32, i32) {
    %c0_i32 = arith.constant 0 : i32
    %c0_i32_0 = arith.constant 0 : i32
    %c0_i32_1 = arith.constant 0 : i32
    return %c0_i32, %c0_i32_0 : i32, i32
  }
  func.func @transform_6(%arg0: i32, %arg1: i32) -> (i32, i32) {
    %c0_i32 = arith.constant 0 : i32
    %c0_i32_0 = arith.constant 0 : i32
    %c0_i32_1 = arith.constant 0 : i32
    return %c0_i32, %c0_i32_0 : i32, i32
  }
  func.func @transform_7(%arg0: i32, %arg1: i32) -> (i32, i32, i32) {
    %c0_i32 = arith.constant 0 : i32
    %c0_i32_0 = arith.constant 0 : i32
    %c0_i32_1 = arith.constant 0 : i32
    return %arg0, %c0_i32, %c0_i32_0 : i32, i32, i32
  }
}

</mosaic_0001>

<bundles_post_ra>
// kernel: tpu_custom_call.1
= control target key start
LH: loop header
LB: loop body
LE: loop exit
PB: predicated region body
PF: predicated region fallthrough
CT: control target
= control target key end

     0   :  { %12 = vsyncpa [#allocation4], 0  ;;  %s2818_s0 = inlined_call_operand.vmem [shape: f32[2,15,6272], index: 0, kind: input, shape index: {}]   ;;  %s2819_s1 = inlined_call_operand.vmem [shape: bf16[8,6272], index: 1, kind: input, shape index: {}]   ;;  %s2820_s2 = inlined_call_operand.vmem [shape: f32[8,15], index: 2, kind: input, shape index: {}]   ;;  %s2821_s3 = inlined_call_operand.vmem [shape: bf16[15,128], index: 3, kind: input, shape index: {}]   ;;  %s2822_s4 = inlined_call_operand.vmem [shape: bf16[8,128], index: 4, kind: input, shape index: {}]   ;;  %s2823_s5 = inlined_call_operand.vmem [shape: f32[128,128], index: 5, kind: input, shape index: {}]   ;;  %s2824_s6 = inlined_call_operand.vmem [shape: f32[1,128], index: 6, kind: input, shape index: {}]   ;;  %s2825_s7 = inlined_call_operand.hbm [shape: f32[2,1,8], index: 7, kind: output, shape index: {}]  }
   0x1   :  { %14 = vsyncpa [#allocation4 + $0x1], 0  ;;  %s2449_s24 = smov 0   ;;  %s2451_s25 = smov 0  }
   0x2   :  { %s2453_s26 = smov 0   ;;  %s2455_s27 = smov 0  }
   0x3   :  { %s2457_s28 = smov 0   ;;  %s2459_s29 = smov 0  }
   0x4 LB: > { %s2040_s30 = sadd.s32 4294967295, %s2402_s29   ;;  %s2041_s8 = sadd.s32 4294967294, %s2402_s29   ;;  %s2402_s29 = sphi %s2459_s29, %s20_s29   ;;  %s2398_s28 = sphi %s2457_s28, %s2832_s28   ;;  %s2394_s27 = sphi %s2455_s27, %s2831_s27   ;;  %s2390_s26 = sphi %s2453_s26, %s2830_s26   ;;  %s2386_s25 = sphi %s2451_s25, %s2829_s25   ;;  %s2382_s24 = sphi %s2449_s24, %s2828_s24  }
   0x5   : > { %s32_s9 = sadd.s32 1, %s2398_s28  ;;  %s198_s10 = sadd.s32 1, %s2390_s26 }
   0x6   : > { %p34_p0 = scmp.ge.s32.totalorder %s32_s9, 2  ;;  %p208_p1 = scmp.ne.s32.totalorder %s2390_s26, %s2386_s25 }
   0x7   : > { %p209_p2 = scmp.eq.s32.totalorder %s2040_s30, 1  ;;  %p214_p3 = scmp.ne.s32.totalorder %s2386_s25, %s2382_s24 }
   0x8   : > { %s2834_s9 = smov (%p34_p0, %s32_s9), 0  ;;  %p215_p5 = scmp.eq.s32.totalorder %s2041_s8, 1 }
   0x9   : > { %p2489_p4 = por %p209_p2, %p208_p1  ;;  %s195_s12 = ssub.s32 %s2398_s28, %s2834_s9 }
   0xa   : > { %p2045_p6 = scmp.ge.s32.totalorder %s2402_s29, 1  ;;  %p196_p7 = scmp.eq.s32.totalorder %s195_s12, 0 }
   0xb   : > { %p2496_p8 = por %p215_p5, %p214_p3  ;;  %p270_p9 = scmp.lt.s32.totalorder %s2402_s29, 3 }
   0xc   : > { %s2502_s14 = scalar_select %p196_p7, %s2390_s26, %s198_s10  }
   0xd   : > { %p271_p10 = pnand %p2045_p6, %p270_p9 }
   0xe   : > { %p311_p11 = scmp.lt.s32.totalorder (!%p271_p10), %s2394_s27, 1  ;;  %v335_v0 = vld [vmem:[%s2819_s1] sm:$0xff] (!%p271_p10)  ;;  %v336_v14 = vld [vmem:[%s2819_s1 + $0x8] sm:$0xff] (!%p271_p10)  ;;  %v341_v33 = vld [vmem:[%s2819_s1 + $0x30] sm:$0xff] (!%p271_p10)  ;;  %vm2405_vm0 = vmmov (!%p271_p10), 0   ;;  %vm332_vm1 = vcmask (!%p271_p10), 121856  }
   0xf   : > { %274 = sbr.rel (%p271_p10) target bundleno = 1064 (0x428), region = 48  ;;  %v2048_v1 = vcombine.high (!%p271_p10), %v335_v0, %v335_v0  ;;  %v339_v2 = vld [vmem:[%s2819_s1 + $0x20] sm:$0xff] (!%p271_p10)  ;;  %v2047_v23 = vcombine.low (!%p271_p10), %v335_v0, %v335_v0  ;;  %v2050_v28 = vcombine.high (!%p271_p10), %v336_v14, %v336_v14  ;;  %v337_v39 = vld [vmem:[%s2819_s1 + $0x10] sm:$0xff] (!%p271_p10)  ;;  %v2060_v41 = vcombine.high (!%p271_p10), %v341_v33, %v341_v33  ;;  %v338_v57 = vld [vmem:[%s2819_s1 + $0x18] sm:$0xff] (!%p271_p10)  ;;  %s308_s22 = sand.u32 (!%p271_p10), 1, %s2386_s25  }
  0x10   : > { %v2056_v3 = vcombine.high (!%p271_p10), %v339_v2, %v339_v2  ;;  %v2055_v36 = vcombine.low (!%p271_p10), %v339_v2, %v339_v2  ;;  %v2049_v45 = vcombine.low (!%p271_p10), %v336_v14, %v336_v14  ;;  %v2052_v47 = vcombine.high (!%p271_p10), %v337_v39, %v337_v39  ;;  %v343_v51 = vld [vmem:[%s2819_s1 + $0x40] sm:$0xff] (!%p271_p10)  ;;  %s309_s30 = scalar_lea.vmem (!%p271_p10), [#allocation3], %s308_s22  ;;  %s1944_s16 = scalar_lea.sflag (!%p271_p10), [#allocation4], %s308_s22 }
  0x11   : > { %711 = vmatprep.mubr.bf16.mxu1 (!%p271_p10), %v2048_v1  ;;  %v2059_v54 = vcombine.low (!%p271_p10), %v341_v33, %v341_v33  ;;  %v2064_v59 = vcombine.high (!%p271_p10), %v343_v51, %v343_v51  ;;  %v2051_v63 = vcombine.low (!%p271_p10), %v337_v39, %v337_v39  ;;  %v2054_v1 = vcombine.high (!%p271_p10), %v338_v57, %v338_v57  ;;  %s1956_s8 = sshll.u32 (!%p271_p10), %s309_s30, 4  ;;  %s2773_s8 = int_to_ptr.vmem [resolvable:$true] %s1956_s8 }
  0x12   : > { %871 = vmatprep.mubr.bf16.mxu0 (!%p271_p10), %v2056_v3  ;;  %vm1695_vm2 = vcmask (!%p271_p10), 1046528   ;;  %vm2407_vm3 = vmmov (!%p271_p10), 1   ;;  %vm1941_vm5 = vcmask (!%p271_p10), 57344   ;;  %s2324_s17 = scalar_lea.vmem (!%p271_p10), %s2773_s8, 16 }
  0x13   : > { %vm2185_vm4 = vmpackc.low (!%p271_p10), %vm1695_vm2, %vm2407_vm3  ;;  %p2325_p12 = scmp.ne.s32.totalorder (!%p271_p10), %s2773_s8, %s2324_s17 }
  0x15   : > { %p2326_p13 = pnand (!%p271_p10), %p2325_p12, %p2489_p4 }
  0x16   : > { %s312_s19 = scalar_select %p311_p11, %s2394_s27, 1 }
  0x17   : > { %p2327_p0 = pneg %p2326_p13 }
  0x18   : > { %s2211_s20 = smul.u32 784, %s312_s19 }
  0x1a   : > { %s2515_s23 = scalar_lea.vmem %s2818_s0, %s2211_s20 }
  0x1b   : > { %v361_v4 = vld [vmem:[%s2515_s23 + $0x8] sm:$0xff]  ;;  %v410_v5 = vld [vmem:[%s2515_s23 + $0x190] sm:$0x7f]  ;;  %v360_v6 = vld [vmem:[%s2515_s23] sm:$0xff] }
  0x1c   : > { %v459_v7 = vpack.c.bf16 %v410_v5, %v361_v4  ;;  %v409_v8 = vld [vmem:[%s2515_s23 + $0x188] sm:$0x7f]  ;;  %v363_v9 = vld [vmem:[%s2515_s23 + $0x18] sm:$0xff]  ;;  %v412_v10 = vld [vmem:[%s2515_s23 + $0x1a0] sm:$0x7f] }
  0x1d   : > { %v458_v11 = vpack.c.bf16 %v409_v8, %v360_v6  ;;  %v461_v12 = vpack.c.bf16 %v412_v10, %v363_v9  ;;  %v362_v13 = vld [vmem:[%s2515_s23 + $0x10] sm:$0xff]  ;;  %v369_v15 = vld [vmem:[%s2515_s23 + $0x48] sm:$0xff]  ;;  %v411_v16 = vld [vmem:[%s2515_s23 + $0x198] sm:$0x7f]  ;;  %v2063_v8 = vcombine.low %v343_v51, %v343_v51 }
  0x1e   : > { %679 = vmatprep.subr.bf16.mxu1 %v459_v7  ;;  %v365_v17 = vld [vmem:[%s2515_s23 + $0x28] sm:$0xff]  ;;  %v418_v18 = vld [vmem:[%s2515_s23 + $0x1d0] sm:$0x7f]  ;;  %v368_v21 = vld [vmem:[%s2515_s23 + $0x40] sm:$0xff]  ;;  %v460_v27 = vpack.c.bf16 %v411_v16, %v362_v13 }
  0x1f   : > { %680 = vmatpush1.bf16.xpose.msra.mxu1 %v458_v11  ;;  %v414_v19 = vld [vmem:[%s2515_s23 + $0x1b0] sm:$0x7f]  ;;  %v467_v20 = vpack.c.bf16 %v418_v18, %v369_v15  ;;  %v417_v22 = vld [vmem:[%s2515_s23 + $0x1c8] sm:$0x7f]  ;;  %v372_v31 = vld [vmem:[%s2515_s23 + $0x60] sm:$0xff] }
  0x20   : > { %719 = vmatprep.subr.bf16.mxu1 %v461_v12  ;;  %v466_v24 = vpack.c.bf16 %v417_v22, %v368_v21  ;;  %v373_v25 = vld [vmem:[%s2515_s23 + $0x68] sm:$0xff]  ;;  %v422_v26 = vld [vmem:[%s2515_s23 + $0x1f0] sm:$0x7f]  ;;  %v463_v30 = vpack.c.bf16 %v414_v19, %v365_v17  ;;  %v364_v37 = vld [vmem:[%s2515_s23 + $0x20] sm:$0xff]  ;;  %v2053_v17 = vcombine.low %v338_v57, %v338_v57 }
  0x21   : > { %839 = vmatprep.subr.bf16.mxu0 %v467_v20  ;;  %v471_v29 = vpack.c.bf16 %v422_v26, %v373_v25  ;;  %v421_v32 = vld [vmem:[%s2515_s23 + $0x1e8] sm:$0x7f]  ;;  %v426_v35 = vld [vmem:[%s2515_s23 + $0x210] sm:$0x7f]  ;;  %v367_v42 = vld [vmem:[%s2515_s23 + $0x38] sm:$0xff] }
  0x22   : > { %840 = vmatpush1.bf16.xpose.msra.mxu0 %v466_v24  ;;  %v377_v34 = vld [vmem:[%s2515_s23 + $0x88] sm:$0xff]  ;;  %v470_v40 = vpack.c.bf16 %v421_v32, %v372_v31  ;;  %v416_v43 = vld [vmem:[%s2515_s23 + $0x1c0] sm:$0x7f]  ;;  %v430_v53 = vld [vmem:[%s2515_s23 + $0x230] sm:$0x7f] }
  0x23   : > { %919 = vmatprep.subr.bf16.mxu0 %v471_v29  ;;  %v413_v38 = vld [vmem:[%s2515_s23 + $0x1a8] sm:$0x7f]  ;;  %v475_v44 = vpack.c.bf16 %v426_v35, %v377_v34  ;;  %v465_v48 = vpack.c.bf16 %v416_v43, %v367_v42  ;;  %v376_v49 = vld [vmem:[%s2515_s23 + $0x80] sm:$0xff]  ;;  %v366_v55 = vld [vmem:[%s2515_s23 + $0x30] sm:$0xff] }
  0x24   : > { %v462_v46 = vpack.c.bf16 %v413_v38, %v364_v37  ;;  %v425_v50 = vld [vmem:[%s2515_s23 + $0x208] sm:$0x7f]  ;;  %v415_v56 = vld [vmem:[%s2515_s23 + $0x1b8] sm:$0x7f]  ;;  %v420_v61 = vld [vmem:[%s2515_s23 + $0x1e0] sm:$0x7f] }
  0x25   : > { %v381_v52 = vld [vmem:[%s2515_s23 + $0xa8] sm:$0xff]  ;;  %v474_v58 = vpack.c.bf16 %v425_v50, %v376_v49  ;;  %v371_v60 = vld [vmem:[%s2515_s23 + $0x58] sm:$0xff]  ;;  %v464_v0 = vpack.c.bf16 %v415_v56, %v366_v55  ;;  %v380_v3 = vld [vmem:[%s2515_s23 + $0xa0] sm:$0xff] }
  0x26   : > { %712 = vmatmul.mubr.bf16.vlgmr.msra.gmra.mrb[0].mxu1 %v2047_v23  ;;  %v479_v62 = vpack.c.bf16 %v430_v53, %v381_v52  ;;  %v469_v2 = vpack.c.bf16 %v420_v61, %v371_v60  ;;  %v429_v4 = vld [vmem:[%s2515_s23 + $0x228] sm:$0x7f]  ;;  %v345_v5 = vld [vmem:[%s2819_s1 + $0x50] sm:$0xff]  ;;  %v419_v10 = vld [vmem:[%s2515_s23 + $0x1d8] sm:$0x7f] }
  0x27   : > { %720 = vmatpush1.bf16.xpose.msra.mxu1 %v460_v27  ;;  %751 = vmatprep.mubr.bf16.mxu1 %v2050_v28  ;;  %v385_v6 = vld [vmem:[%s2515_s23 + $0xc8] sm:$0xff]  ;;  %v434_v7 = vld [vmem:[%s2515_s23 + $0x250] sm:$0x7f]  ;;  %v478_v12 = vpack.c.bf16 %v429_v4, %v380_v3  ;;  %v2068_v13 = vcombine.high %v345_v5, %v345_v5  ;;  %v375_v14 = vld [vmem:[%s2515_s23 + $0x78] sm:$0xff]  ;;  %v2067_v26 = vcombine.low %v345_v5, %v345_v5 }
  0x28   : > { %759 = vmatprep.subr.bf16.mxu1 %v463_v30  ;;  %v370_v9 = vld [vmem:[%s2515_s23 + $0x50] sm:$0xff]  ;;  %v340_v11 = vld [vmem:[%s2819_s1 + $0x28] sm:$0xff]  ;;  %v424_v15 = vld [vmem:[%s2515_s23 + $0x200] sm:$0x7f]  ;;  %v483_v16 = vpack.c.bf16 %v434_v7, %v385_v6 }
  0x29   : > { %872 = vmatmul.mubr.bf16.vlgmr.msra.gmra.mrb[0].mxu0 %v2055_v36  ;;  %v468_v18 = vpack.c.bf16 %v419_v10, %v370_v9  ;;  %v2058_v19 = vcombine.high %v340_v11, %v340_v11  ;;  %v473_v20 = vpack.c.bf16 %v424_v15, %v375_v14  ;;  %v384_v21 = vld [vmem:[%s2515_s23 + $0xc0] sm:$0xff]  ;;  %v433_v22 = vld [vmem:[%s2515_s23 + $0x248] sm:$0x7f]  ;;  %v438_v25 = vld [vmem:[%s2515_s23 + $0x270] sm:$0x7f]  ;;  %v2057_v35 = vcombine.low %v340_v11, %v340_v11 }
  0x2a   : > { %920 = vmatpush1.bf16.xpose.msra.mxu0 %v470_v40  ;;  %951 = vmatprep.mubr.bf16.mxu0 %v2060_v41  ;;  %v347_v23 = vld [vmem:[%s2819_s1 + $0x60] sm:$0xff]  ;;  %v389_v24 = vld [vmem:[%s2515_s23 + $0xe8] sm:$0xff]  ;;  %v374_v27 = vld [vmem:[%s2515_s23 + $0x70] sm:$0xff]  ;;  %v482_v30 = vpack.c.bf16 %v433_v22, %v384_v21 }
  0x2b   : > { %999 = vmatprep.subr.bf16.mxu0 %v475_v44  ;;  %v423_v28 = vld [vmem:[%s2515_s23 + $0x1f8] sm:$0x7f]  ;;  %v2072_v31 = vcombine.high %v347_v23, %v347_v23  ;;  %v428_v33 = vld [vmem:[%s2515_s23 + $0x220] sm:$0x7f]  ;;  %v487_v34 = vpack.c.bf16 %v438_v25, %v389_v24  ;;  %v437_v40 = vld [vmem:[%s2515_s23 + $0x268] sm:$0x7f]  ;;  %v2071_v44 = vcombine.low %v347_v23, %v347_v23 }
  0x2c   : > { %v342_v29 = vld [vmem:[%s2819_s1 + $0x38] sm:$0xff]  ;;  %v472_v36 = vpack.c.bf16 %v423_v28, %v374_v27  ;;  %v388_v39 = vld [vmem:[%s2515_s23 + $0xe0] sm:$0xff]  ;;  %v349_v41 = vld [vmem:[%s2819_s1 + $0x70] sm:$0xff] }
  0x2d   : > { %v379_v32 = vld [vmem:[%s2515_s23 + $0x98] sm:$0xff]  ;;  %v2062_v37 = vcombine.high %v342_v29, %v342_v29  ;;  %v393_v42 = vld [vmem:[%s2515_s23 + $0x108] sm:$0xff]  ;;  %v442_v43 = vld [vmem:[%s2515_s23 + $0x290] sm:$0x7f]  ;;  %v2076_v49 = vcombine.high %v349_v41, %v349_v41  ;;  %v2061_v53 = vcombine.low %v342_v29, %v342_v29 }
  0x2e   : > { %752 = vmatmul.mubr.bf16.vlgmr.msra.gmra.mrb[4].mxu1 %v2049_v45  ;;  %v477_v38 = vpack.c.bf16 %v428_v33, %v379_v32  ;;  %v378_v45 = vld [vmem:[%s2515_s23 + $0x90] sm:$0xff]  ;;  %v383_v50 = vld [vmem:[%s2515_s23 + $0xb8] sm:$0xff]  ;;  %v432_v51 = vld [vmem:[%s2515_s23 + $0x240] sm:$0x7f]  ;;  %v491_v52 = vpack.c.bf16 %v442_v43, %v393_v42 }
  0x2f   : > { %760 = vmatpush1.bf16.xpose.msra.mxu1 %v462_v46  ;;  %791 = vmatprep.mubr.bf16.mxu1 %v2052_v47  ;;  %v427_v46 = vld [vmem:[%s2515_s23 + $0x218] sm:$0x7f]  ;;  %v344_v47 = vld [vmem:[%s2819_s1 + $0x48] sm:$0xff]  ;;  %v481_v56 = vpack.c.bf16 %v432_v51, %v383_v50  ;;  %v392_v57 = vld [vmem:[%s2515_s23 + $0x100] sm:$0xff] }
  0x30   : > { %799 = vmatprep.subr.bf16.mxu1 %v465_v48  ;;  %v486_v48 = vpack.c.bf16 %v437_v40, %v388_v39  ;;  %v2066_v55 = vcombine.high %v344_v47, %v344_v47  ;;  %v397_v60 = vld [vmem:[%s2515_s23 + $0x128] sm:$0xff]  ;;  %v446_v61 = vld [vmem:[%s2515_s23 + $0x2b0] sm:$0x7f]  ;;  %v387_v4 = vld [vmem:[%s2515_s23 + $0xd8] sm:$0xff]  ;;  %v2065_v7 = vcombine.low %v344_v47, %v344_v47 }
  0x31   : > { %952 = vmatmul.mubr.bf16.vlgmr.msra.gmra.mrb[4].mxu0 %v2059_v54  ;;  %v476_v54 = vpack.c.bf16 %v427_v46, %v378_v45  ;;  %v436_v5 = vld [vmem:[%s2515_s23 + $0x260] sm:$0x7f]  ;;  %v495_v6 = vpack.c.bf16 %v446_v61, %v397_v60  ;;  %v401_v14 = vld [vmem:[%s2515_s23 + $0x148] sm:$0xff]  ;;  %v450_v15 = vld [vmem:[%s2515_s23 + $0x2d0] sm:$0x7f] }
  0x32   : > { %1000 = vmatpush1.bf16.xpose.msra.mxu0 %v474_v58  ;;  %1031 = vmatprep.mubr.bf16.mxu0 %v2064_v59  ;;  %v441_v58 = vld [vmem:[%s2515_s23 + $0x288] sm:$0x7f]  ;;  %v351_v59 = vld [vmem:[%s2819_s1 + $0x80] sm:$0xff]  ;;  %v485_v10 = vpack.c.bf16 %v436_v5, %v387_v4  ;;  %v391_v22 = vld [vmem:[%s2515_s23 + $0xf8] sm:$0xff]  ;;  %v499_v24 = vpack.c.bf16 %v450_v15, %v401_v14 }
  0x33   : > { %1079 = vmatprep.subr.bf16.mxu0 %v479_v62  ;;  %v2075_v62 = vcombine.low %v349_v41, %v349_v41  ;;  %v2080_v3 = vcombine.high %v351_v59, %v351_v59  ;;  %v396_v11 = vld [vmem:[%s2515_s23 + $0x120] sm:$0xff]  ;;  %v405_v32 = vld [vmem:[%s2515_s23 + $0x168] sm:$0xff]  ;;  %v454_v33 = vld [vmem:[%s2515_s23 + $0x2f0] sm:$0x7f] }
  0x34   : > { %v440_v23 = vld [vmem:[%s2515_s23 + $0x280] sm:$0x7f]  ;;  %v395_v40 = vld [vmem:[%s2515_s23 + $0x118] sm:$0xff]  ;;  %v503_v42 = vpack.c.bf16 %v454_v33, %v405_v32  ;;  %v394_v51 = vld [vmem:[%s2515_s23 + $0x110] sm:$0xff] }
  0x35   : > { %v489_v28 = vpack.c.bf16 %v440_v23, %v391_v22  ;;  %v400_v29 = vld [vmem:[%s2515_s23 + $0x140] sm:$0xff]  ;;  %v354_v4 = vld [vmem:[%s2819_s1 + $0x98] sm:$0xff]  ;;  %v356_v15 = vld [vmem:[%s2819_s1 + $0xa8] sm:$0xff] }
  0x36   : > { %792 = vmatmul.mubr.bf16.vlgmr.msra.gmra.mrb[8].mxu1 %v2051_v63  ;;  %v382_v63 = vld [vmem:[%s2515_s23 + $0xb0] sm:$0xff]  ;;  %v444_v41 = vld [vmem:[%s2515_s23 + $0x2a0] sm:$0x7f]  ;;  %v451_v14 = vld [vmem:[%s2515_s23 + $0x2d8] sm:$0x7f] }
  0x37   : > { %800 = vmatpush1.bf16.xpose.msra.mxu1 %v464_v0  ;;  %831 = vmatprep.mubr.bf16.mxu1 %v2054_v1  ;;  %v431_v0 = vld [vmem:[%s2515_s23 + $0x238] sm:$0x7f]  ;;  %v493_v46 = vpack.c.bf16 %v444_v41, %v395_v40  ;;  %v404_v47 = vld [vmem:[%s2515_s23 + $0x160] sm:$0xff]  ;;  %v406_v22 = vld [vmem:[%s2515_s23 + $0x170] sm:$0xff] }
  0x38   : > { %879 = vmatprep.subr.bf16.mxu1 %v469_v2  ;;  %v346_v1 = vld [vmem:[%s2819_s1 + $0x58] sm:$0xff]  ;;  %v490_v2 = vpack.c.bf16 %v441_v58, %v392_v57  ;;  %v448_v57 = vld [vmem:[%s2515_s23 + $0x2c0] sm:$0x7f]  ;;  %v1777_v33 = vld [vmem:[%s2823_s5 + $0x8] sm:$0xff] }
  0x39   : > { %1032 = vmatmul.mubr.bf16.vlgmr.msra.gmra.mrb[8].mxu0 %v2063_v8  ;;  %v480_v8 = vpack.c.bf16 %v431_v0, %v382_v63  ;;  %v2070_v9 = vcombine.high %v346_v1, %v346_v1  ;;  %v2069_v25 = vcombine.low %v346_v1, %v346_v1  ;;  %v408_v63 = vld [vmem:[%s2515_s23 + $0x180] sm:$0xff]  ;;  %v457_v0 = vld [vmem:[%s2515_s23 + $0x308] sm:$0x7f]  ;;  %v455_v23 = vld [vmem:[%s2515_s23 + $0x2f8] sm:$0x7f] }
  0x3a   : > { %1080 = vmatpush1.bf16.xpose.msra.mxu0 %v478_v12  ;;  %1111 = vmatprep.mubr.bf16.mxu0 %v2068_v13  ;;  %v445_v12 = vld [vmem:[%s2515_s23 + $0x2a8] sm:$0x7f]  ;;  %v353_v13 = vld [vmem:[%s2819_s1 + $0x90] sm:$0xff]  ;;  %v506_v5 = vpack.c.bf16 %v457_v0, %v408_v63  ;;  %v1776_v32 = vld [vmem:[%s2823_s5] sm:$0xff] }
  0x3b   : > { %1159 = vmatprep.subr.bf16.mxu0 %v483_v16  ;;  %v2079_v16 = vcombine.low %v351_v59, %v351_v59  ;;  %v2084_v21 = vcombine.high %v353_v13, %v353_v13  ;;  %v1782_v41 = vld [vmem:[%s2823_s5 + $0x30] sm:$0xff] }
  0x3e   : > { %832 = vmatmul.mubr.bf16.vlgmr.msra.gmra.mrb[12].mxu1 %v2053_v17  ;;  %v386_v17 = vld [vmem:[%s2515_s23 + $0xd0] sm:$0xff] }
  0x3f   : > { %880 = vmatpush1.bf16.xpose.msra.mxu1 %v468_v18  ;;  %911 = vmatprep.mubr.bf16.mxu1 %v2058_v19  ;;  %v435_v18 = vld [vmem:[%s2515_s23 + $0x258] sm:$0x7f]  ;;  %v348_v19 = vld [vmem:[%s2819_s1 + $0x68] sm:$0xff] }
  0x40   : > { %959 = vmatprep.subr.bf16.mxu1 %v473_v20  ;;  %v494_v20 = vpack.c.bf16 %v445_v12, %v396_v11  ;;  %v2074_v27 = vcombine.high %v348_v19, %v348_v19  ;;  %v2073_v43 = vcombine.low %v348_v19, %v348_v19  ;;  %v2319_v12 = vld [vmem:[%s2819_s1 + $0xc0] ss:$0 sps:$4 sm:$0xff]  }
  0x41   : > { %1112 = vmatmul.mubr.bf16.vlgmr.msra.gmra.mrb[12].mxu0 %v2067_v26  ;;  %v484_v26 = vpack.c.bf16 %v435_v18, %v386_v17  ;;  %v456_v17 = vld [vmem:[%s2515_s23 + $0x300] sm:$0x7f]  ;;  %v2085_v18 = vcombine.low %v354_v4, %v354_v4 }
  0x42   : > { %1160 = vmatpush1.bf16.xpose.msra.mxu0 %v482_v30  ;;  %1191 = vmatprep.mubr.bf16.mxu0 %v2072_v31  ;;  %v449_v30 = vld [vmem:[%s2515_s23 + $0x2c8] sm:$0x7f]  ;;  %v355_v31 = vld [vmem:[%s2819_s1 + $0xa0] sm:$0xff] }
  0x43   : > { %1239 = vmatprep.subr.bf16.mxu0 %v487_v34  ;;  %v2083_v34 = vcombine.low %v353_v13, %v353_v13  ;;  %v2088_v39 = vcombine.high %v355_v31, %v355_v31  ;;  %v2087_v50 = vcombine.low %v355_v31, %v355_v31  ;;  %v402_v13 = vld [vmem:[%s2515_s23 + $0x150] sm:$0xff]  ;;  %v2406_v31 = vmov 0.0|0.0  }
  0x44   : > { %v500_v19 = vpack.c.bf16 %v451_v14, %v402_v13 }
  0x46   : > { %912 = vmatmul.mubr.bf16.vlgmr.msra.gmra.mrb[16].mxu1 %v2057_v35  ;;  %v390_v35 = vld [vmem:[%s2515_s23 + $0xf0] sm:$0xff] }
  0x47   : > { %960 = vmatpush1.bf16.xpose.msra.mxu1 %v472_v36  ;;  %991 = vmatprep.mubr.bf16.mxu1 %v2062_v37  ;;  %v439_v36 = vld [vmem:[%s2515_s23 + $0x278] sm:$0x7f] }
  0x48   : > { %1039 = vmatprep.subr.bf16.mxu1 %v477_v38  ;;  %v350_v37 = vld [vmem:[%s2819_s1 + $0x78] sm:$0xff]  ;;  %v498_v38 = vpack.c.bf16 %v449_v30, %v400_v29  ;;  %v331_v29 = vld [vmem:[%s2820_s2] sm:$0xff] }
  0x49   : > { %1192 = vmatmul.mubr.bf16.vlgmr.msra.gmra.mrb[16].mxu0 %v2071_v44  ;;  %v488_v44 = vpack.c.bf16 %v439_v36, %v390_v35  ;;  %v2078_v45 = vcombine.high %v350_v37, %v350_v37  ;;  %v2077_v58 = vcombine.low %v350_v37, %v350_v37  ;;  %333 = vst.msk [vmem:[#allocation2] sm:$0xff] %vm332_vm1, %v331_v29  ;;  %v2103_v30 = vld [vmem:[%s2821_s3] sm:$0xff]   ;;  %v1779_v36 = vld [vmem:[%s2823_s5 + $0x18] sm:$0xff] }
  0x4a   : > { %1240 = vmatpush1.bf16.xpose.msra.mxu0 %v486_v48  ;;  %1271 = vmatprep.mubr.bf16.mxu0 %v2076_v49  ;;  %v453_v48 = vld [vmem:[%s2515_s23 + $0x2e8] sm:$0x7f]  ;;  %v357_v49 = vld [vmem:[%s2819_s1 + $0xb0] sm:$0xff]  ;;  %v2188_v35 = vpack.c.bf16 %v1777_v33, %v1776_v32 }
  0x4b   : > { %1319 = vmatprep.subr.bf16.mxu0 %v491_v52  ;;  %v443_v52 = vld [vmem:[%s2515_s23 + $0x298] sm:$0x7f]  ;;  %v2091_v1 = vcombine.low %v357_v49, %v357_v49 }
  0x4c   : > { %v492_v59 = vpack.c.bf16 %v443_v52, %v394_v51 }
  0x4e   : > { %992 = vmatmul.mubr.bf16.vlgmr.msra.gmra.mrb[20].mxu1 %v2061_v53  ;;  %v352_v53 = vld [vmem:[%s2819_s1 + $0x88] sm:$0xff] }
  0x4f   : > { %1040 = vmatpush1.bf16.xpose.msra.mxu1 %v476_v54  ;;  %1071 = vmatprep.mubr.bf16.mxu1 %v2066_v55  ;;  %v502_v54 = vpack.c.bf16 %v453_v48, %v404_v47  ;;  %v2092_v55 = vcombine.high %v357_v49, %v357_v49  ;;  %v2082_v60 = vcombine.high %v352_v53, %v352_v53 }
  0x50   : > { %1119 = vmatprep.subr.bf16.mxu1 %v481_v56  ;;  %v399_v56 = vld [vmem:[%s2515_s23 + $0x138] sm:$0xff] }
  0x51   : > { %1272 = vmatmul.mubr.bf16.vlgmr.msra.gmra.mrb[20].mxu0 %v2075_v62  ;;  %v497_v61 = vpack.c.bf16 %v448_v57, %v399_v56  ;;  %v2404_v62 = vmov 0.0  }
  0x52   : > { %1320 = vmatpush1.bf16.xpose.msra.mxu0 %v490_v2  ;;  %1351 = vmatprep.mubr.bf16.mxu0 %v2080_v3  ;;  %v398_v2 = vld [vmem:[%s2515_s23 + $0x130] sm:$0xff]  ;;  %v447_v3 = vld [vmem:[%s2515_s23 + $0x2b8] sm:$0x7f] }
  0x53   : > { %1399 = vmatprep.subr.bf16.mxu0 %v495_v6  ;;  %v403_v6 = vld [vmem:[%s2515_s23 + $0x158] sm:$0xff] }
  0x56   : > { %1072 = vmatmul.mubr.bf16.vlgmr.msra.gmra.mrb[24].mxu1 %v2065_v7  ;;  %v452_v7 = vld [vmem:[%s2515_s23 + $0x2e0] sm:$0x7f] }
  0x57   : > { %1120 = vmatpush1.bf16.xpose.msra.mxu1 %v480_v8  ;;  %1151 = vmatprep.mubr.bf16.mxu1 %v2070_v9  ;;  %v2081_v8 = vcombine.low %v352_v53, %v352_v53  ;;  %v496_v9 = vpack.c.bf16 %v447_v3, %v398_v2  ;;  %v501_v11 = vpack.c.bf16 %v452_v7, %v403_v6 }
  0x58   : > { %1199 = vmatprep.subr.bf16.mxu1 %v485_v10  ;;  %v2086_v10 = vcombine.high %v354_v4, %v354_v4 }
  0x59   : > { %1352 = vmatmul.mubr.bf16.vlgmr.msra.gmra.mrb[24].mxu0 %v2079_v16  ;;  %v407_v16 = vld [vmem:[%s2515_s23 + $0x178] sm:$0xff]  ;;  %s2099_s23 = sshll.u32 %s2394_s27, 4  ;;  %s2408_s27 = smov [#allocation3]  }
  0x5a   : > { %1400 = vmatpush1.bf16.xpose.msra.mxu0 %v494_v20  ;;  %1431 = vmatprep.mubr.bf16.mxu0 %v2084_v21  ;;  %v2090_v20 = vcombine.high %v356_v15, %v356_v15  ;;  %v505_v21 = vpack.c.bf16 %v456_v17, %v407_v16  ;;  %s2771_s15 = scalar_lea.hbm %s2825_s7, %s2099_s23  ;;  %s2328_s18 = sshll.u32 %s2408_s27, 4  ;;  %s2329_s18 = int_to_ptr.vmem [resolvable:$false] %s2328_s18 }
  0x5b   : > { %1479 = vmatprep.subr.bf16.mxu0 %v499_v24  ;;  %v358_v24 = vld [vmem:[%s2819_s1 + $0xb8] sm:$0xff]  ;;  %s2330_s19 = scalar_lea.vmem %s2329_s18, 32  ;;  %p2331_p1 = scmp.lt.s32.totalorder %s2773_s8, %s2329_s18 }
  0x5c   : > { %p2332_p2 = scmp.lt.s32.totalorder %s2330_s19, %s2324_s17 }
  0x5e   : > { %1152 = vmatmul.mubr.bf16.vlgmr.msra.gmra.mrb[28].mxu1 %v2069_v25  ;;  %v2089_v25 = vcombine.low %v356_v15, %v356_v15  ;;  %p2333_p3 = por %p2332_p2, %p2331_p1 }
  0x5f   : > { %1200 = vmatpush1.bf16.xpose.msra.mxu1 %v484_v26  ;;  %1231 = vmatprep.mubr.bf16.mxu1 %v2074_v27  ;;  %v504_v26 = vpack.c.bf16 %v455_v23, %v406_v22  ;;  %v2094_v27 = vcombine.high %v358_v24, %v358_v24 }
  0x60   : > { %1279 = vmatprep.subr.bf16.mxu1 %v489_v28  ;;  %v2093_v28 = vcombine.low %v358_v24, %v358_v24  ;;  %p2334_p5 = pnand %p2333_p3, %p2327_p0 }
  0x61   : > { %1432 = vmatmul.mubr.bf16.vlgmr.msra.gmra.mrb[28].mxu0 %v2083_v34  ;;  %v1778_v34 = vld [vmem:[%s2823_s5 + $0x10] sm:$0xff] }
  0x62   : > { %1480 = vmatpush1.bf16.xpose.msra.mxu0 %v498_v38  ;;  %1511 = vmatprep.mubr.bf16.mxu0 %v2088_v39  ;;  %v2191_v37 = vpack.c.bf16 %v1779_v36, %v1778_v34  ;;  %v1780_v38 = vld [vmem:[%s2823_s5 + $0x20] sm:$0xff]  ;;  %v1781_v39 = vld [vmem:[%s2823_s5 + $0x28] sm:$0xff] }
  0x63   : > { %1559 = vmatprep.subr.bf16.mxu0 %v503_v42  ;;  %v2194_v40 = vpack.c.bf16 %v1781_v39, %v1780_v38  ;;  %v1783_v42 = vld [vmem:[%s2823_s5 + $0x38] sm:$0xff] }
  0x66   : > { %1232 = vmatmul.mubr.bf16.vlgmr.msra.gmra.mrb[32].mxu1 %v2073_v43 }
  0x67   : > { %1280 = vmatpush1.bf16.xpose.msra.mxu1 %v488_v44  ;;  %1311 = vmatprep.mubr.bf16.mxu1 %v2078_v45 }
  0x68   : > { %1359 = vmatprep.subr.bf16.mxu1 %v493_v46  ;;  %v2197_v46 = vpack.c.bf16 %v1783_v42, %v1782_v41 }
  0x69   : > { %1512 = vmatmul.mubr.bf16.vlgmr.msra.gmra.mrb[32].mxu0 %v2087_v50 }
  0x6a   : > { %1560 = vmatpush1.bf16.xpose.msra.mxu0 %v502_v54  ;;  %1591 = vmatprep.mubr.bf16.mxu0 %v2092_v55 }
  0x6b   : > { %2130 = vmatprep.subr.bf16.mxu0 %v2404_v62 }
  0x6e   : > { %1312 = vmatmul.mubr.bf16.vlgmr.msra.gmra.mrb[36].mxu1 %v2077_v58 }
  0x6f   : > { %1360 = vmatpush1.bf16.xpose.msra.mxu1 %v492_v59  ;;  %1391 = vmatprep.mubr.bf16.mxu1 %v2082_v60 }
  0x70   : > { %1439 = vmatprep.subr.bf16.mxu1 %v497_v61 }
  0x71   : > { %1592 = vmatmul.mubr.bf16.vlgmr.msra.gmra.mrb[36].mxu0 %v2091_v1 }
  0x72   : > { %2131 = vmatpush3.bf16.xpose.msra.mxu0 %v506_v5  ;;  %2132 = vmatprep.mubr.msk.bf16.mxu0 %vm2405_vm0, %v2404_v62 }
  0x73   : > { %2187 = vmatprep.subr.bf16.mxu0 %v2406_v31 }
  0x76   : > { %1392 = vmatmul.mubr.bf16.vlgmr.msra.gmra.mrb[40].mxu1 %v2081_v8 }
  0x77   : > { %1440 = vmatpush1.bf16.xpose.msra.mxu1 %v496_v9  ;;  %1471 = vmatprep.mubr.bf16.mxu1 %v2086_v10 }
  0x78   : > { %1519 = vmatprep.subr.bf16.mxu1 %v501_v11 }
  0x79   : > { %2133 = vmatmul.mubr.bf16.vlgmr.msra.gmra.mrb[40].mxu0 %v2319_v12 }
  0x7a   : > { %2175 = vmatprep.mubr.msk.f32.mxu0 %vm2405_vm0, %v2404_v62  ;;  %2189 = vmatpush3.bf16.msra.mxu0 %v2188_v35 }
  0x7b   : > { %2190 = vmatprep.subr.bf16.mxu0 %v2406_v31 }
  0x7e   : > { %1472 = vmatmul.mubr.bf16.vlgmr.msra.gmra.mrb[44].mxu1 %v2085_v18  ;;  %2192 = vmatpush3.bf16.msra.mxu0 %v2191_v37 }
  0x7f   : > { %1520 = vmatpush1.bf16.xpose.msra.mxu1 %v500_v19  ;;  %1551 = vmatprep.mubr.bf16.mxu1 %v2090_v20 }
  0x80   : > { %1599 = vmatprep.subr.bf16.mxu1 %v505_v21  ;;  %2193 = vmatprep.subr.bf16.mxu0 %v2406_v31 }
  0x82   : > { %2195 = vmatpush3.bf16.msra.mxu0 %v2194_v40 }
  0x83   : > { %2196 = vmatprep.subr.bf16.mxu0 %v2406_v31 }
  0x86   : > { %1552 = vmatmul.mubr.bf16.vlgmr.msra.gmra.mrb[48].mxu1 %v2089_v25  ;;  %2198 = vmatpush3.bf16.msra.mxu0 %v2197_v46 }
  0x87   : > { %1600 = vmatpush1.bf16.xpose.msra.mxu1 %v504_v26  ;;  %1631 = vmatprep.mubr.bf16.mxu1 %v2094_v27 }
  0x88   : > { %2183 = vmatprep.subr.bf16.mxu1 %v2406_v31  ;;  %2199 = vmatprep.subr.bf16.mxu0 %v2406_v31 }
  0x8e   : > { %1632 = vmatmul.mubr.bf16.vlgmr.msra.gmra.mrb[52].mxu1 %v2093_v28 }
  0x8f   : > { %2140 = vmatprep.mubr.msk.f32.mxu1 %vm2405_vm0, %v2404_v62  ;;  %2186 = vmatpush3.bf16.msk.msra.mxu1 %vm2185_vm4, %v2103_v30 }
  0x90   : > { %2178 = vmatprep.subr.mxu1 %v2404_v62 }
  0xf9   : > { %v713_v43 = vpop.f32.mrb[0].mxu1 }
  0xfa   : > { %v715_v44 = vpop.f32.mrb[1].mxu1 }
  0xfb   : > { %v716_v45 = vpop.f32.mrb[2].mxu1 }
  0xfc   : > { %v717_v47 = vpop.f32.mrb[3].mxu1  ;;  %v873_v48 = vpop.f32.mrb[0].mxu0 }
  0xfd   : > { %v875_v49 = vpop.f32.mrb[1].mxu0 }
  0xfe   : > { %v876_v50 = vpop.f32.mrb[2].mxu0 }
  0xff   : > { %v877_v52 = vpop.f32.mrb[3].mxu0 }
 0x101   : > { %v753_v51 = vpop.f32.mrb[4].mxu1 }
 0x102   : > { %v754_v53 = vadd.f32 %v753_v51, %v713_v43  ;;  %v755_v54 = vpop.f32.mrb[5].mxu1 }
 0x103   : > { %v756_v55 = vpop.f32.mrb[6].mxu1 }
 0x104   : > { %v757_v56 = vpop.f32.mrb[7].mxu1  ;;  %v953_v57 = vpop.f32.mrb[4].mxu0 }
 0x105   : > { %v955_v58 = vpop.f32.mrb[5].mxu0 }
 0x106   : > { %v956_v59 = vpop.f32.mrb[6].mxu0 }
 0x107   : > { %v957_v61 = vpop.f32.mrb[7].mxu0 }
 0x109   : > { %v793_v60 = vpop.f32.mrb[8].mxu1 }
 0x10a   : > { %v794_v63 = vadd.f32 %v793_v60, %v754_v53  ;;  %v795_v0 = vpop.f32.mrb[9].mxu1 }
 0x10b   : > { %v796_v1 = vpop.f32.mrb[10].mxu1 }
 0x10c   : > { %v797_v2 = vpop.f32.mrb[11].mxu1  ;;  %v1033_v3 = vpop.f32.mrb[8].mxu0 }
 0x10d   : > { %v1035_v4 = vpop.f32.mrb[9].mxu0 }
 0x10e   : > { %v1036_v5 = vpop.f32.mrb[10].mxu0 }
 0x10f   : > { %v1037_v7 = vpop.f32.mrb[11].mxu0 }
 0x111   : > { %v833_v6 = vpop.f32.mrb[12].mxu1 }
 0x112   : > { %v834_v8 = vadd.f32 %v833_v6, %v794_v63  ;;  %v835_v9 = vpop.f32.mrb[13].mxu1 }
 0x113   : > { %v836_v10 = vpop.f32.mrb[14].mxu1 }
 0x114   : > { %v874_v11 = vadd.f32 %v873_v48, %v834_v8  ;;  %v837_v12 = vpop.f32.mrb[15].mxu1  ;;  %v1113_v13 = vpop.f32.mrb[12].mxu0 }
 0x115   : > { %v1115_v14 = vpop.f32.mrb[13].mxu0 }
 0x116   : > { %v1116_v15 = vpop.f32.mrb[14].mxu0 }
 0x117   : > { %v1117_v17 = vpop.f32.mrb[15].mxu0 }
 0x119   : > { %v913_v16 = vpop.f32.mrb[16].mxu1 }
 0x11a   : > { %v914_v18 = vadd.f32 %v913_v16, %v874_v11  ;;  %v915_v19 = vpop.f32.mrb[17].mxu1 }
 0x11b   : > { %v916_v20 = vpop.f32.mrb[18].mxu1 }
 0x11c   : > { %v954_v21 = vadd.f32 %v953_v57, %v914_v18  ;;  %v917_v22 = vpop.f32.mrb[19].mxu1  ;;  %v1193_v23 = vpop.f32.mrb[16].mxu0 }
 0x11d   : > { %v1195_v24 = vpop.f32.mrb[17].mxu0 }
 0x11e   : > { %v1196_v25 = vpop.f32.mrb[18].mxu0 }
 0x11f   : > { %v1197_v27 = vpop.f32.mrb[19].mxu0 }
 0x121   : > { %v993_v26 = vpop.f32.mrb[20].mxu1 }
 0x122   : > { %v994_v28 = vadd.f32 %v993_v26, %v954_v21  ;;  %v995_v29 = vpop.f32.mrb[21].mxu1 }
 0x123   : > { %v996_v30 = vpop.f32.mrb[22].mxu1 }
 0x124   : > { %v1034_v32 = vadd.f32 %v1033_v3, %v994_v28  ;;  %v997_v33 = vpop.f32.mrb[23].mxu1  ;;  %v1273_v34 = vpop.f32.mrb[20].mxu0 }
 0x125   : > { %v1275_v35 = vpop.f32.mrb[21].mxu0 }
 0x126   : > { %v1276_v36 = vpop.f32.mrb[22].mxu0 }
 0x127   : > { %v1277_v38 = vpop.f32.mrb[23].mxu0 }
 0x129   : > { %v1073_v37 = vpop.f32.mrb[24].mxu1 }
 0x12a   : > { %v1074_v39 = vadd.f32 %v1073_v37, %v1034_v32  ;;  %v1075_v40 = vpop.f32.mrb[25].mxu1 }
 0x12b   : > { %v1076_v41 = vpop.f32.mrb[26].mxu1 }
 0x12c   : > { %v1114_v42 = vadd.f32 %v1113_v13, %v1074_v39  ;;  %v1077_v43 = vpop.f32.mrb[27].mxu1  ;;  %v1353_v44 = vpop.f32.mrb[24].mxu0  ;;  %v334_v41 = vld [vmem:[#allocation2] sm:$0xff] }
 0x12d   : > { %v1355_v45 = vpop.f32.mrb[25].mxu0 }
 0x12e   : > { %v1356_v46 = vpop.f32.mrb[26].mxu0 }
 0x12f   : > { %v1357_v48 = vpop.f32.mrb[27].mxu0  ;;  %v1690_v46 = vld [vmem:[%s2822_s4] sm:$0xf] }
 0x130   : > { %v1691_v48 = vunpack.c.l.bf16 %v1690_v46 }
 0x131   : > { %v1153_v47 = vpop.f32.mrb[28].mxu1 }
 0x132   : > { %v1154_v49 = vadd.f32 %v1153_v47, %v1114_v42  ;;  %v1155_v50 = vpop.f32.mrb[29].mxu1 }
 0x133   : > { %v1156_v51 = vpop.f32.mrb[30].mxu1  ;;  %v1785_v50 = vld [vmem:[%s2823_s5 + $0x48] sm:$0xff] }
 0x134   : > { %v1194_v52 = vadd.f32 %v1193_v23, %v1154_v49  ;;  %v1157_v53 = vpop.f32.mrb[31].mxu1  ;;  %v1433_v54 = vpop.f32.mrb[28].mxu0  ;;  %v1784_v49 = vld [vmem:[%s2823_s5 + $0x40] sm:$0xff] }
 0x135   : > { %v1435_v55 = vpop.f32.mrb[29].mxu0  ;;  %v2200_v51 = vpack.c.bf16 %v1785_v50, %v1784_v49 }
 0x136   : > { %v1436_v56 = vpop.f32.mrb[30].mxu0  ;;  %v1789_v55 = vld [vmem:[%s2823_s5 + $0x68] sm:$0xff] }
 0x137   : > { %v1437_v58 = vpop.f32.mrb[31].mxu0  ;;  %2201 = vmatpush3.bf16.msra.mxu0 %v2200_v51 }
 0x138   : > { %2202 = vmatprep.subr.bf16.mxu0 %v2406_v31  ;;  %v1791_v58 = vld [vmem:[%s2823_s5 + $0x78] sm:$0xff] }
 0x139   : > { %v1233_v57 = vpop.f32.mrb[32].mxu1 }
 0x13a   : > { %v1234_v59 = vadd.f32 %v1233_v57, %v1194_v52  ;;  %v1235_v60 = vpop.f32.mrb[33].mxu1  ;;  %v1786_v52 = vld [vmem:[%s2823_s5 + $0x50] sm:$0xff] }
 0x13b   : > { %v1236_v61 = vpop.f32.mrb[34].mxu1  ;;  %v1790_v57 = vld [vmem:[%s2823_s5 + $0x70] sm:$0xff] }
 0x13c   : > { %v1274_v63 = vadd.f32 %v1273_v34, %v1234_v59  ;;  %v1237_v0 = vpop.f32.mrb[35].mxu1  ;;  %v1513_v1 = vpop.f32.mrb[32].mxu0  ;;  %v2209_v59 = vpack.c.bf16 %v1791_v58, %v1790_v57 }
 0x13d   : > { %v1515_v2 = vpop.f32.mrb[33].mxu0 }
 0x13e   : > { %v1516_v3 = vpop.f32.mrb[34].mxu0 }
 0x13f   : > { %v1517_v5 = vpop.f32.mrb[35].mxu0 }
 0x140   : > { %v1792_v5 = vld [vmem:[%s2824_s6] sm:$0x1] }
 0x141   : > { %v1313_v4 = vpop.f32.mrb[36].mxu1 }
 0x142   : > { %v1314_v6 = vadd.f32 %v1313_v4, %v1274_v63  ;;  %v1315_v7 = vpop.f32.mrb[37].mxu1 }
 0x143   : > { %v1316_v8 = vpop.f32.mrb[38].mxu1 }
 0x144   : > { %v1354_v9 = vadd.f32 %v1353_v44, %v1314_v6  ;;  %v1317_v10 = vpop.f32.mrb[39].mxu1  ;;  %v1593_v11 = vpop.f32.mrb[36].mxu0 }
 0x145   : > { %v1595_v12 = vpop.f32.mrb[37].mxu0 }
 0x146   : > { %v1596_v13 = vpop.f32.mrb[38].mxu0 }
 0x147   : > { %v1597_v15 = vpop.f32.mrb[39].mxu0 }
 0x149   : > { %v1393_v14 = vpop.f32.mrb[40].mxu1 }
 0x14a   : > { %v1394_v16 = vadd.f32 %v1393_v14, %v1354_v9  ;;  %v1395_v17 = vpop.f32.mrb[41].mxu1 }
 0x14b   : > { %v1396_v18 = vpop.f32.mrb[42].mxu1 }
 0x14c   : > { %v1434_v19 = vadd.f32 %v1433_v54, %v1394_v16  ;;  %v1397_v20 = vpop.f32.mrb[43].mxu1  ;;  %v1673_v21 = vpop.f32.mrb[40].mxu0  ;;  %v1788_v54 = vld [vmem:[%s2823_s5 + $0x60] sm:$0xff] }
 0x14d   : > { %v2134_v22 = vpop.f32.mrb[41].mxu0  ;;  %v2206_v56 = vpack.c.bf16 %v1789_v55, %v1788_v54 }
 0x14e   : > { %v1676_v23 = vpop.f32.mrb[42].mxu0 }
 0x14f   : > { %v2135_v25 = vpop.f32.mrb[43].mxu0 }
 0x151   : > { %v1473_v24 = vpop.f32.mrb[44].mxu1 }
 0x152   : > { %v1474_v26 = vadd.f32 %v1473_v24, %v1434_v19  ;;  %v1475_v27 = vpop.f32.mrb[45].mxu1 }
 0x153   : > { %v1476_v28 = vpop.f32.mrb[46].mxu1 }
 0x154   : > { %v1514_v29 = vadd.f32 %v1513_v1, %v1474_v26  ;;  %v1477_v30 = vpop.f32.mrb[47].mxu1 }
 0x159   : > { %v1553_v32 = vpop.f32.mrb[48].mxu1 }
 0x15a   : > { %v1554_v33 = vadd.f32 %v1553_v32, %v1514_v29  ;;  %v1555_v34 = vpop.f32.mrb[49].mxu1 }
 0x15b   : > { %v1556_v35 = vpop.f32.mrb[50].mxu1 }
 0x15c   : > { %v1594_v36 = vadd.f32 %v1593_v11, %v1554_v33  ;;  %v1557_v37 = vpop.f32.mrb[51].mxu1 }
 0x161   : > { %v1633_v38 = vpop.f32.mrb[52].mxu1 }
 0x162   : > { %v1634_v39 = vadd.f32 %v1633_v38, %v1594_v36  ;;  %v1635_v40 = vpop.f32.mrb[53].mxu1 }
 0x163   : > { %v1636_v42 = vpop.f32.mrb[54].mxu1 }
 0x164   : > { %v1674_v43 = vadd.f32 %v1673_v21, %v1634_v39  ;;  %v1637_v44 = vpop.f32.mrb[55].mxu1 }
 0x166   : > { %v1679_v45 = vadd.f32 %v1674_v43, %v334_v41 }
 0x168   : > { %1681 = vst.msk [vmem:[#allocation2] sm:$0xff] %vm332_vm1, %v1679_v45 }
 0x16f   : > { %v1685_v47 = vld [vmem:[#allocation2] sm:$0xff] }
 0x170   : > { %2141 = vmatmul.mubr.msk.f32.vlgmr.msra.gmra.mrb[56].mxu1 %vm332_vm1, %v1685_v47 }
 0x171   : > { %2179 = vmatpush3.xpose.msra.mxu1 %v1691_v48  ;;  %2180 = vmatprep.mubr.msk.f32.mxu1 %vm2405_vm0, %v2404_v62  ;;  %v1787_v62 = vld [vmem:[%s2823_s5 + $0x58] sm:$0xff] }
 0x172   : > { %v2203_v53 = vpack.c.bf16 %v1787_v62, %v1786_v52 }
 0x174   : > { %2204 = vmatpush3.bf16.msra.mxu0 %v2203_v53 }
 0x175   : > { %2205 = vmatprep.subr.bf16.mxu0 %v2406_v31 }
 0x178   : > { %2207 = vmatpush3.bf16.msra.mxu0 %v2206_v56 }
 0x179   : > { %2208 = vmatprep.subr.bf16.mxu0 %v2406_v31 }
 0x17c   : > { %2210 = vmatpush3.bf16.msra.mxu0 %v2209_v59 }
 0x243   : > { %v1765_v60 = vpop.f32.mrb[56].mxu1 }
 0x244   : > { %v1769_v61 = vmul.f32 %v1765_v60, %v1691_v48  ;;  %v2142_v63 = vpop.f32.mrb[57].mxu1 }
 0x246   : > { %v1770_v0 = vrot.slane %v1769_v61, 4 }
 0x248   : > { %v1771_v1 = vadd.f32 %v1770_v0, %v1769_v61 }
 0x24a   : > { %v1772_v2 = vrot.slane %v1771_v1, 2 }
 0x24c   : > { %v1773_v3 = vadd.f32 %v1772_v2, %v1771_v1 }
 0x24e   : > { %v1774_v4 = vrot.slane %v1773_v3, 1 }
 0x250   : > { %v1775_v31 = vadd.f32 %v1774_v4, %v1773_v3 }
 0x252   : > { %2176 = vmatmul.mubr.f32.vlgmr.msra.gmra.mrb[44].mxu0 %v1775_v31 }
 0x325   : > { %v1859_v6 = vpop.f32.mrb[44].mxu0 }
 0x326   : > { %v1860_v7 = vadd.f32 %v1859_v6, %v1792_v5  ;;  %v2177_v8 = vpop.f32.mrb[45].mxu0 }
 0x328   : > { %v2098_v9 = vmul.f32 -1.442695, %v1860_v7 }
 0x32a   : > { %2320 = vpow2.f32 %v2098_v9 }
 0x334   : > { %v2321_v10 = vpop.eup %2320 }
 0x335   : > { %v1866_v11 = vadd.f32 1.0, %v2321_v10 }
 0x337   : > { %2322 = vrcp.f32 %v1866_v11 }
 0x341   : > { %v2323_v12 = vpop.eup %2322 }
 0x342   : > { %v1869_v13 = vmul.f32 %v2323_v12, %v1775_v31 }
 0x344   : > { %2181 = vmatmul.mubr.f32.vlgmr.msra.gmra.mrb[58].mxu1 %v1869_v13 }
 0x417   : > { %v1936_v14 = vpop.f32.mrb[58].mxu1 }
 0x418   : > { %v1940_v15 = vmul.f32 0.06666667, %v1936_v14  ;;  %v2182_v16 = vpop.f32.mrb[59].mxu1 }
 0x41a   : > { %1942 = vst.msk [vmem:[%s309_s30] sm:$0x1] %vm1941_vm5, %v1940_v15 }
 0x41b   : > { %2337 = shalt.err (!%p2334_p5)
}
 0x41c   : > { %s2338_s20 = scalar_lea.hbm %s2771_s15, 16  ;;  %s2342_s23 = scalar_lea.hbm %s2825_s7, 32 }
 0x41d   : > { %p2339_p6 = scmp.ne.s32.totalorder %s2771_s15, %s2338_s20  ;;  %p2343_p10 = scmp.lt.u32.totalorder %s2771_s15, %s2825_s7 }
 0x41e   : > { %p2344_p11 = scmp.lt.u32.totalorder %s2342_s23, %s2338_s20  ;;  %p2346_p13 = scmp.lt.u32.totalorder %s2338_s20, %s2771_s15 }
 0x41f   : > { %p2340_p7 = pnand %p2339_p6, %p2489_p4 }
 0x420   : > { %p2345_p12 = por %p2344_p11, %p2343_p10 }
 0x421   : > { %p2341_p9 = pneg %p2340_p7 }
 0x422   : > { %p2347_p0 = por %p2346_p13, %p2345_p12 }
 0x424   : > { %p2348_p1 = pnand %p2347_p0, %p2341_p9 }
 0x426   : > { %2351 = shalt.err (!%p2348_p1)
}
 0x427   : > { %2212 = dma.vmem_to_hbm [thread:$0]  (%p2489_p4), %s2773_s8, 16, %s2771_s15, %s1944_s16  }
 0x428 PF: > { %p2218_p2 = scmp.ge.s32.totalorder %s2402_s29, 2  ;;  %s1968_s12 = sand.u32 1, %s2382_s24  }
 0x429   : > { %s1969_s17 = scalar_lea.sflag [#allocation4], %s1968_s12 }
 0x42a   : > { %p2215_p3 = pnand %p2218_p2, %p2496_p8 }
 0x42c   : > { %2377 = dma.done.wait (!%p2215_p3), %s1969_s17, 16  }
 0x42d   : > { %2379 = vsyncadd (!%p2215_p3), %s1969_s17, 4294967280  ;;  %s20_s29 = sadd.s32 1, %s2402_s29   ;;  %s2828_s24 = smov %s2386_s25 }
 0x42e   : > { %p17_p5 = scmp.ge.s32.totalorder %s20_s29, 4   ;;  %s2829_s25 = smov %s2390_s26 }
 0x42f   : > { %s2830_s26 = smov %s2502_s14  ;;  %s2831_s27 = smov %s2398_s28 }
 0x430   : > { %s2832_s28 = smov %s2834_s9  ;;  %19 = sbr.rel (!%p17_p5) target bundleno = 4 (0x4), region = 94 }
 0x437   :  { %1973 = vsyncpa [#allocation4], 1 }
 0x438   :  { %1975 = vsyncpa [#allocation4 + $0x1], 1 }

</bundles_post_ra>
